<compile_context>
chip_gen: v7x
topology: tpu7x:2x2x1
jax: 0.10.0
libtpu: 0.0.40
codegen_flags: <defaults>
</compile_context>

<pallas_src>
import functools

import jax
import jax.numpy as jnp
from jax.experimental import pallas as pl
from jax.experimental.pallas import tpu as pltpu


def _round_up(x, m):
    return ((x + m - 1) // m) * m


def _sublane(itemsize):
    # Sublane packing multiple for the input dtype (f32:8, bf16:16, int8/fp8:32).
    return {4: 8, 2: 16, 1: 32}.get(itemsize, 8)


def _vmem_budget():
    """Returns (pred double-buffer budget, vmem_limit_bytes) per generation."""
    try:
        cap = int(pltpu.get_tpu_info().vmem_capacity_bytes)
    except Exception:
        cap = None
    if cap is not None and cap > 96 * 1024 * 1024:
        # v5e / v6e: 128 MiB physical VMEM per TensorCore.
        return 48 * 1024 * 1024, 96 * 1024 * 1024
    # v7x (64 MiB per TC) or unknown: stay conservative.
    return 20 * 1024 * 1024, 48 * 1024 * 1024


def _choose_tile_m(n_rows, n_classes, itemsize, vmem_budget_bytes):
    sub = _sublane(itemsize)
    # VMEM per tile row: double-buffered input tile + ~4 tile-sized f32
    # elementwise temporaries (cast / exp(x-m) / target-select / iota).
    per_row_bytes = n_classes * (2 * itemsize + 4 * 4)
    max_rows = max(sub, vmem_budget_bytes // per_row_bytes)
    # Target >= ~4 MiB of pred per grid step so the ~0.35us per-step overhead
    # is amortized even for small class counts; never cap below 1024 rows.
    target_bytes = 4 * 1024 * 1024
    cap = max(1024, target_bytes // max(1, n_classes * itemsize))
    tile_m = min(cap, max_rows)
    # Keep >= 4 grid steps when the batch permits: lets v7x's two TensorCores
    # split the "parallel" grid axis and keeps the DMA pipeline busy.
    if n_rows >= 4 * sub:
        tile_m = min(tile_m, _round_up(-(-n_rows // 4), sub))
    tile_m = min(tile_m, _round_up(n_rows, sub))
    return max(sub, (tile_m // sub) * sub)


def _label_smoothing_kernel(pred_ref, tgt_ref, loss_ref, *,
                            confidence, off_value, n_rows, tile_m, mask_rows):
    x = pred_ref[...].astype(jnp.float32)                     # (tile_m, C)
    tgt = tgt_ref[...]                                         # (tile_m, 1) int32

    # Numerically stable logsumexp over the full (unpadded) class axis.
    m = jnp.max(x, axis=-1, keepdims=True)                     # (tile_m, 1)
    lse = jnp.log(jnp.sum(jnp.exp(x - m), axis=-1, keepdims=True)) + m

    # sum_c(true_dist) == 1  =>  loss_row = lse - sum_c(true_dist * x), and
    #   sum_c(true_dist * x) = off * sum_c(x) + (conf - off) * x[target].
    col = jax.lax.broadcasted_iota(jnp.int32, x.shape, 1)
    x_sum = jnp.sum(x, axis=-1, keepdims=True)
    x_tgt = jnp.sum(jnp.where(col == tgt, x, 0.0), axis=-1, keepdims=True)
    loss = (lse
            - jnp.float32(off_value) * x_sum
            - jnp.float32(confidence - off_value) * x_tgt)

    if mask_rows:
        # Last grid block is partial: its out-of-range rows hold garbage input
        # (possibly NaN/inf). Zero them before the wrapper-side batch sum.
        row = (jax.lax.broadcasted_iota(jnp.int32, (tile_m, 1), 0)
               + pl.program_id(0) * tile_m)
        loss = jnp.where(row < n_rows, loss, 0.0)

    loss_ref[...] = loss


def label_smoothing_loss(pred, target, *, classes, smoothing=0.0, tile_m=None):
    """pred: (N, C) float, target: (N,) int -> scalar float32 (batch mean)."""
    n, c = pred.shape
    assert c == classes
    confidence = 1.0 - smoothing
    off_value = smoothing / (classes - 1) if classes > 1 else 0.0

    itemsize = jnp.dtype(pred.dtype).itemsize
    sub = _sublane(itemsize)
    budget, vmem_limit = _vmem_budget()
    if tile_m is None:
        tile_m = _choose_tile_m(n, c, itemsize, budget)
    tile_m = max(sub, (tile_m // sub) * sub)

    n_tiles = pl.cdiv(n, tile_m)
    tgt2 = target.astype(jnp.int32).reshape(n, 1)

    kernel = functools.partial(
        _label_smoothing_kernel,
        confidence=confidence,
        off_value=off_value,
        n_rows=n,
        tile_m=tile_m,
        mask_rows=(n % tile_m != 0),
    )

    # pred is passed unpadded: the class axis is covered by a full-extent block
    # (legal for any C), and the partial last row-block is handled by Pallas'
    # masked read/writeback plus the in-kernel row mask.
    per_row = pl.pallas_call(
        kernel,
        out_shape=jax.ShapeDtypeStruct((n, 1), jnp.float32),
        grid_spec=pltpu.PrefetchScalarGridSpec(
            num_scalar_prefetch=0,
            grid=(n_tiles,),
            in_specs=[
                pl.BlockSpec((tile_m, c), lambda i: (i, 0)),
                pl.BlockSpec((tile_m, 1), lambda i: (i, 0)),
            ],
            out_specs=pl.BlockSpec((tile_m, 1), lambda i: (i, 0)),
        ),
        compiler_params=pltpu.CompilerParams(
            dimension_semantics=("parallel",),
            vmem_limit_bytes=vmem_limit,
        ),
    )(pred, tgt2)

    # Batch mean, applied exactly once (masked / non-existent rows contribute 0).
    return jnp.sum(per_row) / jnp.float32(n)


def _reference(pred, target, *, classes, smoothing):
    confidence = 1.0 - smoothing
    logp = jax.nn.log_softmax(pred.astype(jnp.float32), axis=-1)
    true_dist = jnp.full_like(logp, smoothing / (classes - 1))
    true_dist = true_dist.at[jnp.arange(pred.shape[0]), target].set(confidence)
    return jnp.mean(jnp.sum(-true_dist * logp, axis=-1))


if __name__ == "__main__":
    key = jax.random.PRNGKey(0)
    k_pred, k_tgt = jax.random.split(key)

    # Small shapes consistent with the module's forward: pred (N, C), target (N,)
    N, C = 16, 32
    smoothing = 0.1
    pred = jax.random.normal(k_pred, (N, C), dtype=jnp.float32)
    target = jax.random.randint(k_tgt, (N,), 0, C, dtype=jnp.int32)

    loss = label_smoothing_loss(pred, target, classes=C, smoothing=smoothing)
    loss = jax.block_until_ready(loss)
    ref = _reference(pred, target, classes=C, smoothing=smoothing)
    assert jnp.allclose(loss, ref, atol=1e-5, rtol=1e-5), (loss, ref)

    # N not a multiple of 8, C not a multiple of 128 (no padding anywhere now).
    k2p, k2t = jax.random.split(jax.random.PRNGKey(1))
    N2, C2 = 13, 40
    pred2 = jax.random.normal(k2p, (N2, C2), dtype=jnp.float32)
    target2 = jax.random.randint(k2t, (N2,), 0, C2, dtype=jnp.int32)
    loss2 = jax.block_until_ready(
        label_smoothing_loss(pred2, target2, classes=C2, smoothing=0.2))
    ref2 = _reference(pred2, target2, classes=C2, smoothing=0.2)
    assert jnp.allclose(loss2, ref2, atol=1e-5, rtol=1e-5), (loss2, ref2)

    # Multi-tile path with a partial last row-block (exercises the in-kernel
    # row mask + "parallel" grid axis across >= 4 steps).
    k3p, k3t = jax.random.split(jax.random.PRNGKey(2))
    N3, C3 = 100, 128
    pred3 = jax.random.normal(k3p, (N3, C3), dtype=jnp.float32)
    target3 = jax.random.randint(k3t, (N3,), 0, C3, dtype=jnp.int32)
    loss3 = jax.block_until_ready(
        label_smoothing_loss(pred3, target3, classes=C3, smoothing=0.1))
    ref3 = _reference(pred3, target3, classes=C3, smoothing=0.1)
    assert jnp.allclose(loss3, ref3, atol=1e-5, rtol=1e-5), (loss3, ref3)

    print("KERNEL_OK")
</pallas_src>

<mosaic_0001>
module attributes {stable_mosaic.version = 11 : i64} {
  func.func @_label_smoothing_kernel(%arg0: i32, %arg1: memref<16x32xf32, #tpu.memory_space<vmem>>, %arg2: memref<16x1xi32, #tpu.memory_space<vmem>>, %arg3: memref<16x1xf32, #tpu.memory_space<vmem>>) attributes {dimension_semantics = [#tpu.dimension_semantics<parallel>], iteration_bounds = array<i64: 1>, scalar_prefetch = 0 : i64, scratch_operands = 0 : i64, tpu.core_type = #tpu.core_type<tc>, window_params = [{transform_indices = @transform_0, window_bounds = array<i64: 16, 32>}, {transform_indices = @transform_1, window_bounds = array<i64: 16, 1>}, {transform_indices = @transform_2, window_bounds = array<i64: 16, 1>}]} {
    %c0 = arith.constant 0 : index
    %c0_0 = arith.constant 0 : index
    %0 = vector.load %arg1[%c0, %c0_0] : memref<16x32xf32, #tpu.memory_space<vmem>>, vector<16x32xf32>
    %c0_1 = arith.constant 0 : index
    %c0_2 = arith.constant 0 : index
    %1 = vector.load %arg2[%c0_1, %c0_2] : memref<16x1xi32, #tpu.memory_space<vmem>>, vector<16x1xi32>
    %cst = arith.constant dense<0xFF800000> : vector<16xf32>
    %2 = vector.multi_reduction <maximumf>, %0, %cst [1] : vector<16x32xf32> to vector<16xf32>
    %3 = vector.shape_cast %2 : vector<16xf32> to vector<16x1xf32>
    %4 = vector.broadcast %3 : vector<16x1xf32> to vector<16x32xf32>
    %5 = arith.subf %0, %4 : vector<16x32xf32>
    %6 = math.exp %5 : vector<16x32xf32>
    %cst_3 = arith.constant dense<0.000000e+00> : vector<16xf32>
    %7 = vector.multi_reduction <add>, %6, %cst_3 [1] : vector<16x32xf32> to vector<16xf32>
    %8 = vector.shape_cast %7 : vector<16xf32> to vector<16x1xf32>
    %9 = math.log %8 : vector<16x1xf32>
    %10 = arith.addf %9, %3 : vector<16x1xf32>
    %11 = tpu.iota {dimensions = array<i32: 1>} : vector<16x32xi32>
    %cst_4 = arith.constant dense<0.000000e+00> : vector<16xf32>
    %12 = vector.multi_reduction <add>, %0, %cst_4 [1] : vector<16x32xf32> to vector<16xf32>
    %13 = vector.shape_cast %12 : vector<16xf32> to vector<16x1xf32>
    %14 = vector.broadcast %1 : vector<16x1xi32> to vector<16x32xi32>
    %15 = arith.cmpi eq, %11, %14 : vector<16x32xi32>
    %cst_5 = arith.constant 0.000000e+00 : f32
    %16 = vector.broadcast %cst_5 : f32 to vector<16x32xf32>
    %17 = arith.select %15, %0, %16 : vector<16x32xi1>, vector<16x32xf32>
    %cst_6 = arith.constant dense<0.000000e+00> : vector<16xf32>
    %18 = vector.multi_reduction <add>, %17, %cst_6 [1] : vector<16x32xf32> to vector<16xf32>
    %19 = vector.shape_cast %18 : vector<16xf32> to vector<16x1xf32>
    %cst_7 = arith.constant 0.0032258064 : f32
    %20 = vector.broadcast %cst_7 : f32 to vector<16x1xf32>
    %21 = arith.mulf %20, %13 : vector<16x1xf32>
    %22 = arith.subf %10, %21 : vector<16x1xf32>
    %cst_8 = arith.constant 0.896774172 : f32
    %23 = vector.broadcast %cst_8 : f32 to vector<16x1xf32>
    %24 = arith.mulf %23, %19 : vector<16x1xf32>
    %25 = arith.subf %22, %24 : vector<16x1xf32>
    %c0_9 = arith.constant 0 : index
    %c0_10 = arith.constant 0 : index
    %26 = vector.load %arg3[%c0_9, %c0_10] : memref<16x1xf32, #tpu.memory_space<vmem>>, vector<16x1xf32>
    tpu.vector_store %arg3[%c0_9, %c0_10], %25 {strides = array<i32>} : memref<16x1xf32, #tpu.memory_space<vmem>>, vector<16x1xf32>,
    return
  }
  func.func @transform_0(%arg0: i32) -> (i32, i32) {
    %c0_i32 = arith.constant 0 : i32
    %c0_i32_0 = arith.constant 0 : i32
    return %arg0, %c0_i32 : i32, i32
  }
  func.func @transform_1(%arg0: i32) -> (i32, i32) {
    %c0_i32 = arith.constant 0 : i32
    %c0_i32_0 = arith.constant 0 : i32
    return %arg0, %c0_i32 : i32, i32
  }
  func.func @transform_2(%arg0: i32) -> (i32, i32) {
    %c0_i32 = arith.constant 0 : i32
    %c0_i32_0 = arith.constant 0 : i32
    return %arg0, %c0_i32 : i32, i32
  }
}

</mosaic_0001>

<bundles_post_ra>
// kernel: tpu_custom_call.1
= control target key start
LH: loop header
LB: loop body
LE: loop exit
PB: predicated region body
PF: predicated region fallthrough
CT: control target
= control target key end

     0   :  { %vm15_vm0 = vcmask 261120   ;;  %v90_v2 = vmov 0   ;;  %v40_v13 = vlaneseq  ;;  %vm72_vm3 = vcmask 7168   ;;  %s132_s0 = inlined_call_operand.vmem [shape: f32[16,32], index: 0, kind: input, shape index: {}]   ;;  %s133_s1 = inlined_call_operand.vmem [shape: s32[16,1], index: 1, kind: input, shape index: {}]   ;;  %s134_s2 = inlined_call_operand.vmem [shape: f32[16,1], index: 2, kind: output, shape index: {}]  }
   0x1   :  { %v11_v0 = vld [vmem:[%s132_s0] sm:$0xff]  ;;  %v12_v1 = vld [vmem:[%s132_s0 + $0x8] sm:$0xff]  ;;  %80 = vset.pattern.permute.xlu1 %v90_v2  ;;  %81 = vset.pattern.permute.xlu0 %v90_v2 }
   0x2   :  { %v13_v3 = vld [vmem:[%s133_s1] sm:$0xff]  ;;  %v16_v4 = vsel %vm15_vm0, %v11_v0, -inf  ;;  %v14_v5 = vld [vmem:[%s133_s1 + $0x8] sm:$0xff]  ;;  %v19_v6 = vsel %vm15_vm0, %v12_v1, -inf  ;;  %v41_v17 = vand.u32 127, %v40_v13  ;;  %v42_v18 = vsel %vm15_vm0, %v11_v0, 0.0 }
   0x3   :  { %49 = vperm.xlu1 %80, %v13_v3   ;;  %17 = vmax.xlane.f32.xlu0 %v16_v4  ;;  %v45_v22 = vsel %vm15_vm0, %v12_v1, 0.0 }
   0x7   :  { %52 = vperm.xlu1 %80, %v14_v5   ;;  %20 = vmax.xlane.f32.xlu0 %v19_v6 }
  0x82   :  { %v50_v15 = vpop.permute.xlu1 %49 }
  0x83   :  { %vm54_vm1 = vcmp.eq.s32.totalorder %v41_v17, %v50_v15 }
  0x84   :  { %v56_v23 = vsel %vm54_vm1, %v11_v0, 0.0 }
  0x85   :  { %v58_v24 = vsel %vm15_vm0, %v56_v23, 0.0 }
  0x86   :  { %v53_v21 = vpop.permute.xlu1 %52 }
  0x87   :  { %vm55_vm2 = vcmp.eq.s32.totalorder %v41_v17, %v53_v21 }
  0x88   :  { %v57_v25 = vsel %vm55_vm2, %v12_v1, 0.0 }
  0x89   :  { %v61_v26 = vsel %vm15_vm0, %v57_v25, 0.0 }
  0x90   :  { %v18_v7 = vpop.xlane.xlu0 %17 }
  0x91   :  { %v22_v8 = vsub.f32 %v11_v0, %v18_v7 }
  0x93   :  { %v24_v9 = vmul.f32 1.442695, %v22_v8 }
  0x94   :  { %v21_v10 = vpop.xlane.xlu0 %20 }
  0x95   :  { %82 = vpow2.f32 %v24_v9  ;;  %v23_v11 = vsub.f32 %v12_v1, %v21_v10 }
  0x97   :  { %v26_v12 = vmul.f32 1.442695, %v23_v11 }
  0x99   :  { %84 = vpow2.f32 %v26_v12 }
  0x9f   :  { %v83_v14 = vpop.eup %82 }
  0xa0   :  { %v28_v16 = vsel %vm15_vm0, %v83_v14, 0.0 }
  0xa1   :  { %29 = vadd.xlane.f32.xlu0 %v28_v16 }
  0xa3   :  { %v85_v19 = vpop.eup %84 }
  0xa4   :  { %v31_v20 = vsel %vm15_vm0, %v85_v19, 0.0 }
  0xa5   :  { %43 = vadd.xlane.f32.xlu0 %v42_v18  ;;  %32 = vadd.xlane.f32.xlu1 %v31_v20 }
  0xa9   :  { %46 = vadd.xlane.f32.xlu0 %v45_v22 }
  0xad   :  { %59 = vadd.xlane.f32.xlu0 %v58_v24 }
  0xb1   :  { %62 = vadd.xlane.f32.xlu0 %v61_v26 }
 0x12e   :  { %v30_v27 = vpop.xlane.xlu0 %29 }
 0x12f   :  { %86 = vlog2.f32 %v30_v27 }
 0x132   :  { %v33_v28 = vpop.xlane.xlu1 %32  ;;  %v44_v29 = vpop.xlane.xlu0 %43 }
 0x133   :  { %88 = vlog2.f32 %v33_v28  ;;  %v64_v35 = vmul.f32 0.0032258064, %v44_v29 }
 0x136   :  { %v47_v30 = vpop.xlane.xlu0 %46 }
 0x137   :  { %v65_v42 = vmul.f32 0.0032258064, %v47_v30 }
 0x139   :  { %v87_v31 = vpop.eup %86 }
 0x13a   :  { %v35_v32 = vmul.f32 0.6931472, %v87_v31  ;;  %v60_v33 = vpop.xlane.xlu0 %59 }
 0x13b   :  { %v68_v36 = vmul.f32 0.8967742, %v60_v33 }
 0x13c   :  { %v38_v34 = vadd.f32 %v35_v32, %v18_v7 }
 0x13d   :  { %v89_v37 = vpop.eup %88 }
 0x13e   :  { %v37_v38 = vmul.f32 0.6931472, %v89_v37  ;;  %v66_v39 = vsub.f32 %v38_v34, %v64_v35  ;;  %v63_v40 = vpop.xlane.xlu0 %62 }
 0x13f   :  { %v69_v45 = vmul.f32 0.8967742, %v63_v40 }
 0x140   :  { %v39_v41 = vadd.f32 %v37_v38, %v21_v10  ;;  %v70_v43 = vsub.f32 %v66_v39, %v68_v36 }
 0x142   :  { %v67_v44 = vsub.f32 %v39_v41, %v65_v42  ;;  %73 = vst.msk [vmem:[%s134_s2] sm:$0xff] %vm72_vm3, %v70_v43 }
 0x144   :  { %v71_v46 = vsub.f32 %v67_v44, %v69_v45 }
 0x146   :  { %74 = vst.msk [vmem:[%s134_s2 + $0x8] sm:$0xff] %vm72_vm3, %v71_v46 }

</bundles_post_ra>
